<compile_context>
chip_gen: v7x
topology: tpu7x:2x2x1
jax: 0.10.0
libtpu: 0.0.40
codegen_flags: <defaults>
</compile_context>

<pallas_src>
import functools

import jax
import jax.numpy as jnp
from jax.experimental import pallas as pl
from jax.experimental.pallas import tpu as pltpu


def _autoencoder_kernel(x_ref,
                        w1_ref, b1_ref, w2_ref, b2_ref, w34_ref, b34_ref,
                        w5_ref, b5_ref, w6_ref, b6_ref,
                        o_ref):
    """Fused 5-matmul MLP autoencoder forward for one (TB, x_dim) batch tile."""

    def linear(h, w_ref, b_ref):
        # MXU matmul with f32 accumulation; bias add in f32.
        return jnp.dot(h.astype(w_ref.dtype), w_ref[...],
                       preferred_element_type=jnp.float32) + b_ref[...]

    h = x_ref[...]                                     # already in compute dtype
    h = jnp.maximum(linear(h, w1_ref, b1_ref), 0.0)    # fc1 + relu
    h = jnp.maximum(linear(h, w2_ref, b2_ref), 0.0)    # fc2 + relu
    h = jnp.maximum(linear(h, w34_ref, b34_ref), 0.0)  # fused fc3->fc4 + relu
    h = jnp.maximum(linear(h, w5_ref, b5_ref), 0.0)    # fc5 + relu
    logits = linear(h, w6_ref, b6_ref)                 # fc6
    o_ref[...] = jax.nn.sigmoid(logits).astype(o_ref.dtype)


def _round_up(n, m):
    return ((n + m - 1) // m) * m


def _resident_spec(shape):
    # Whole array as one block, same block for every grid step -> stays in VMEM.
    return pl.BlockSpec(shape, lambda i: tuple(0 for _ in shape))


@functools.partial(jax.jit, static_argnames=("block_batch", "compute_dtype"))
def autoencoder_forward(x, params, *, block_batch=512, compute_dtype=jnp.float32):
    """params: dict of w1..w6 with shape (in, out) and b1..b6 with shape (1, out)."""
    batch, x_dim = x.shape
    h_dim1 = params["w1"].shape[1]
    h_dim2 = params["w2"].shape[1]

    # --- algebraic fc3/fc4 fusion (no activation between them) ------------------
    w34 = params["w3"] @ params["w4"]                       # (h_dim2, h_dim2)
    b34 = params["b3"] @ params["w4"] + params["b4"]        # (1, h_dim2)

    # --- batch tiling / padding --------------------------------------------------
    tb = min(block_batch, _round_up(batch, 8))
    padded_batch = _round_up(batch, tb)
    if padded_batch != batch:
        x = jnp.pad(x, ((0, padded_batch - batch), (0, 0)))
    grid = (padded_batch // tb,)

    # --- operand prep: compute dtype for x & weights, f32 bias/accumulate --------
    x_in = x.astype(compute_dtype)
    weights = [params["w1"], params["w2"], w34, params["w5"], params["w6"]]
    biases = [params["b1"], params["b2"], b34, params["b5"], params["b6"]]
    weights = [w.astype(compute_dtype) for w in weights]
    biases = [b.astype(jnp.float32) for b in biases]

    operands = [x_in]
    in_specs = [pl.BlockSpec((tb, x_dim), lambda i: (i, 0))]
    for w, b in zip(weights, biases):
        operands += [w, b]
        in_specs += [_resident_spec(w.shape), _resident_spec(b.shape)]

    out_specs = pl.BlockSpec((tb, x_dim), lambda i: (i, 0))
    out_shape = jax.ShapeDtypeStruct((padded_batch, x_dim), jnp.float32)

    # --- cost estimate (post-fusion) ---------------------------------------------
    flops = 2 * padded_batch * (x_dim * h_dim1 + h_dim1 * h_dim2 + h_dim2 * h_dim2
                                + h_dim2 * h_dim1 + h_dim1 * x_dim)
    itemsize = jnp.dtype(compute_dtype).itemsize
    bytes_accessed = (padded_batch * x_dim * (itemsize + 4)            # x in, out
                      + sum(int(w.size) * itemsize for w in weights)
                      + sum(int(b.size) * 4 for b in biases))
    cost = pl.CostEstimate(flops=flops,
                           transcendentals=padded_batch * x_dim,        # sigmoid
                           bytes_accessed=bytes_accessed)

    out = pl.pallas_call(
        _autoencoder_kernel,
        out_shape=out_shape,
        grid=grid,
        in_specs=in_specs,
        out_specs=out_specs,
        compiler_params=pltpu.CompilerParams(
            dimension_semantics=("parallel",)),
        cost_estimate=cost,
    )(*operands)

    if padded_batch != batch:
        out = out[:batch]
    return out


def init_params(key, x_dim, h_dim1, h_dim2, z_dim):
    """Deterministic synthetic parameters (PyTorch-Linear-like scaled init)."""
    dims = [(x_dim, h_dim1), (h_dim1, h_dim2), (h_dim2, z_dim),
            (z_dim, h_dim2), (h_dim2, h_dim1), (h_dim1, x_dim)]
    params = {}
    keys = jax.random.split(key, 2 * len(dims))
    for i, (fan_in, fan_out) in enumerate(dims):
        bound = 1.0 / jnp.sqrt(fan_in)
        params[f"w{i + 1}"] = jax.random.uniform(
            keys[2 * i], (fan_in, fan_out), jnp.float32, -bound, bound)
        params[f"b{i + 1}"] = jax.random.uniform(
            keys[2 * i + 1], (1, fan_out), jnp.float32, -bound, bound)
    return params


def reference_forward(x, params):
    """Plain-JAX reference matching the PyTorch module semantics (unfused)."""
    h = jnp.maximum(x @ params["w1"] + params["b1"], 0.0)
    h = jnp.maximum(h @ params["w2"] + params["b2"], 0.0)
    z = h @ params["w3"] + params["b3"]
    h = jnp.maximum(z @ params["w4"] + params["b4"], 0.0)
    h = jnp.maximum(h @ params["w5"] + params["b5"], 0.0)
    return jax.nn.sigmoid(h @ params["w6"] + params["b6"])


if __name__ == "__main__":
    # Small shapes consistent with the module: 64 -> 32 -> 16 -> 2 -> 16 -> 32 -> 64.
    # batch=48 with block_batch=32 exercises the batch grid (2 tiles) + padding path.
    batch, x_dim, h_dim1, h_dim2, z_dim = 48, 64, 32, 16, 2

    key = jax.random.PRNGKey(0)
    k_x, k_p = jax.random.split(key)
    x = jax.random.normal(k_x, (batch, x_dim), jnp.float32)
    params = init_params(k_p, x_dim, h_dim1, h_dim2, z_dim)

    ref = reference_forward(x, params)

    # f32 compute path (tight tolerance; only fc3/fc4 reassociation differs).
    out_f32 = jax.block_until_ready(
        autoencoder_forward(x, params, block_batch=32, compute_dtype=jnp.float32))
    assert out_f32.shape == (batch, x_dim)
    assert jnp.allclose(out_f32, ref, atol=1e-4, rtol=1e-4), "f32 mismatch vs reference"

    # bf16 compute path (halves HBM traffic; looser tolerance, f32 accumulation).
    out_bf16 = jax.block_until_ready(
        autoencoder_forward(x, params, block_batch=32, compute_dtype=jnp.bfloat16))
    assert out_bf16.shape == (batch, x_dim)
    assert jnp.allclose(out_bf16, ref, atol=3e-2, rtol=3e-2), "bf16 mismatch vs reference"

    print("KERNEL_OK")
</pallas_src>

<mosaic_0001>
module attributes {stable_mosaic.version = 11 : i64} {
  func.func @_autoencoder_kernel(%arg0: i32, %arg1: memref<32x64xf32, #tpu.memory_space<vmem>>, %arg2: memref<64x32xf32, #tpu.memory_space<vmem>>, %arg3: memref<1x32xf32, #tpu.memory_space<vmem>>, %arg4: memref<32x16xf32, #tpu.memory_space<vmem>>, %arg5: memref<1x16xf32, #tpu.memory_space<vmem>>, %arg6: memref<16x16xf32, #tpu.memory_space<vmem>>, %arg7: memref<1x16xf32, #tpu.memory_space<vmem>>, %arg8: memref<16x32xf32, #tpu.memory_space<vmem>>, %arg9: memref<1x32xf32, #tpu.memory_space<vmem>>, %arg10: memref<32x64xf32, #tpu.memory_space<vmem>>, %arg11: memref<1x64xf32, #tpu.memory_space<vmem>>, %arg12: memref<32x64xf32, #tpu.memory_space<vmem>>) attributes {dimension_semantics = [#tpu.dimension_semantics<parallel>], iteration_bounds = array<i64: 2>, scalar_prefetch = 0 : i64, scratch_operands = 0 : i64, tpu.core_type = #tpu.core_type<tc>, window_params = [{transform_indices = @transform_0, window_bounds = array<i64: 32, 64>}, {pipeline_mode = #tpu.pipeline_mode<synchronous>, transform_indices = @transform_1, window_bounds = array<i64: 64, 32>}, {pipeline_mode = #tpu.pipeline_mode<synchronous>, transform_indices = @transform_2, window_bounds = array<i64: 1, 32>}, {pipeline_mode = #tpu.pipeline_mode<synchronous>, transform_indices = @transform_3, window_bounds = array<i64: 32, 16>}, {pipeline_mode = #tpu.pipeline_mode<synchronous>, transform_indices = @transform_4, window_bounds = array<i64: 1, 16>}, {pipeline_mode = #tpu.pipeline_mode<synchronous>, transform_indices = @transform_5, window_bounds = array<i64: 16, 16>}, {pipeline_mode = #tpu.pipeline_mode<synchronous>, transform_indices = @transform_6, window_bounds = array<i64: 1, 16>}, {pipeline_mode = #tpu.pipeline_mode<synchronous>, transform_indices = @transform_7, window_bounds = array<i64: 16, 32>}, {pipeline_mode = #tpu.pipeline_mode<synchronous>, transform_indices = @transform_8, window_bounds = array<i64: 1, 32>}, {pipeline_mode = #tpu.pipeline_mode<synchronous>, transform_indices = @transform_9, window_bounds = array<i64: 32, 64>}, {pipeline_mode = #tpu.pipeline_mode<synchronous>, transform_indices = @transform_10, window_bounds = array<i64: 1, 64>}, {transform_indices = @transform_11, window_bounds = array<i64: 32, 64>}]} {
    %c0 = arith.constant 0 : index
    %c0_0 = arith.constant 0 : index
    %0 = vector.load %arg1[%c0, %c0_0] : memref<32x64xf32, #tpu.memory_space<vmem>>, vector<32x64xf32>
    %c0_1 = arith.constant 0 : index
    %c0_2 = arith.constant 0 : index
    %1 = vector.load %arg2[%c0_1, %c0_2] : memref<64x32xf32, #tpu.memory_space<vmem>>, vector<64x32xf32>
    %cst = arith.constant dense<0.000000e+00> : vector<32x32xf32>
    %2 = tpu.matmul %0, %1, %cst {dimension_numbers = #tpu.dot_dimension_numbers<[1], [0], [0], [1], [0, 0, 1, 1], [], []>} : vector<32x64xf32>, vector<64x32xf32>, vector<32x32xf32> -> vector<32x32xf32>
    %c0_3 = arith.constant 0 : index
    %c0_4 = arith.constant 0 : index
    %3 = vector.load %arg3[%c0_3, %c0_4] : memref<1x32xf32, #tpu.memory_space<vmem>>, vector<1x32xf32>
    %4 = vector.broadcast %3 : vector<1x32xf32> to vector<32x32xf32>
    %5 = arith.addf %2, %4 : vector<32x32xf32>
    %cst_5 = arith.constant 0.000000e+00 : f32
    %6 = vector.broadcast %cst_5 : f32 to vector<32x32xf32>
    %7 = arith.maximumf %5, %6 : vector<32x32xf32>
    %c0_6 = arith.constant 0 : index
    %c0_7 = arith.constant 0 : index
    %8 = vector.load %arg4[%c0_6, %c0_7] : memref<32x16xf32, #tpu.memory_space<vmem>>, vector<32x16xf32>
    %cst_8 = arith.constant dense<0.000000e+00> : vector<32x16xf32>
    %9 = tpu.matmul %7, %8, %cst_8 {dimension_numbers = #tpu.dot_dimension_numbers<[1], [0], [0], [1], [0, 0, 1, 1], [], []>} : vector<32x32xf32>, vector<32x16xf32>, vector<32x16xf32> -> vector<32x16xf32>
    %c0_9 = arith.constant 0 : index
    %c0_10 = arith.constant 0 : index
    %10 = vector.load %arg5[%c0_9, %c0_10] : memref<1x16xf32, #tpu.memory_space<vmem>>, vector<1x16xf32>
    %11 = vector.broadcast %10 : vector<1x16xf32> to vector<32x16xf32>
    %12 = arith.addf %9, %11 : vector<32x16xf32>
    %cst_11 = arith.constant 0.000000e+00 : f32
    %13 = vector.broadcast %cst_11 : f32 to vector<32x16xf32>
    %14 = arith.maximumf %12, %13 : vector<32x16xf32>
    %c0_12 = arith.constant 0 : index
    %c0_13 = arith.constant 0 : index
    %15 = vector.load %arg6[%c0_12, %c0_13] : memref<16x16xf32, #tpu.memory_space<vmem>>, vector<16x16xf32>
    %cst_14 = arith.constant dense<0.000000e+00> : vector<32x16xf32>
    %16 = tpu.matmul %14, %15, %cst_14 {dimension_numbers = #tpu.dot_dimension_numbers<[1], [0], [0], [1], [0, 0, 1, 1], [], []>} : vector<32x16xf32>, vector<16x16xf32>, vector<32x16xf32> -> vector<32x16xf32>
    %c0_15 = arith.constant 0 : index
    %c0_16 = arith.constant 0 : index
    %17 = vector.load %arg7[%c0_15, %c0_16] : memref<1x16xf32, #tpu.memory_space<vmem>>, vector<1x16xf32>
    %18 = vector.broadcast %17 : vector<1x16xf32> to vector<32x16xf32>
    %19 = arith.addf %16, %18 : vector<32x16xf32>
    %cst_17 = arith.constant 0.000000e+00 : f32
    %20 = vector.broadcast %cst_17 : f32 to vector<32x16xf32>
    %21 = arith.maximumf %19, %20 : vector<32x16xf32>
    %c0_18 = arith.constant 0 : index
    %c0_19 = arith.constant 0 : index
    %22 = vector.load %arg8[%c0_18, %c0_19] : memref<16x32xf32, #tpu.memory_space<vmem>>, vector<16x32xf32>
    %cst_20 = arith.constant dense<0.000000e+00> : vector<32x32xf32>
    %23 = tpu.matmul %21, %22, %cst_20 {dimension_numbers = #tpu.dot_dimension_numbers<[1], [0], [0], [1], [0, 0, 1, 1], [], []>} : vector<32x16xf32>, vector<16x32xf32>, vector<32x32xf32> -> vector<32x32xf32>
    %c0_21 = arith.constant 0 : index
    %c0_22 = arith.constant 0 : index
    %24 = vector.load %arg9[%c0_21, %c0_22] : memref<1x32xf32, #tpu.memory_space<vmem>>, vector<1x32xf32>
    %25 = vector.broadcast %24 : vector<1x32xf32> to vector<32x32xf32>
    %26 = arith.addf %23, %25 : vector<32x32xf32>
    %cst_23 = arith.constant 0.000000e+00 : f32
    %27 = vector.broadcast %cst_23 : f32 to vector<32x32xf32>
    %28 = arith.maximumf %26, %27 : vector<32x32xf32>
    %c0_24 = arith.constant 0 : index
    %c0_25 = arith.constant 0 : index
    %29 = vector.load %arg10[%c0_24, %c0_25] : memref<32x64xf32, #tpu.memory_space<vmem>>, vector<32x64xf32>
    %cst_26 = arith.constant dense<0.000000e+00> : vector<32x64xf32>
    %30 = tpu.matmul %28, %29, %cst_26 {dimension_numbers = #tpu.dot_dimension_numbers<[1], [0], [0], [1], [0, 0, 1, 1], [], []>} : vector<32x32xf32>, vector<32x64xf32>, vector<32x64xf32> -> vector<32x64xf32>
    %c0_27 = arith.constant 0 : index
    %c0_28 = arith.constant 0 : index
    %31 = vector.load %arg11[%c0_27, %c0_28] : memref<1x64xf32, #tpu.memory_space<vmem>>, vector<1x64xf32>
    %32 = vector.broadcast %31 : vector<1x64xf32> to vector<32x64xf32>
    %33 = arith.addf %30, %32 : vector<32x64xf32>
    %34 = arith.negf %33 : vector<32x64xf32>
    %35 = math.exp %34 : vector<32x64xf32>
    %cst_29 = arith.constant 1.000000e+00 : f32
    %36 = vector.broadcast %cst_29 : f32 to vector<32x64xf32>
    %37 = arith.addf %36, %35 : vector<32x64xf32>
    %38 = arith.divf %36, %37 : vector<32x64xf32>
    %c0_30 = arith.constant 0 : index
    %c0_31 = arith.constant 0 : index
    %39 = vector.load %arg12[%c0_30, %c0_31] : memref<32x64xf32, #tpu.memory_space<vmem>>, vector<32x64xf32>
    tpu.vector_store %arg12[%c0_30, %c0_31], %38 {strides = array<i32>} : memref<32x64xf32, #tpu.memory_space<vmem>>, vector<32x64xf32>,
    return
  }
  func.func @transform_0(%arg0: i32) -> (i32, i32) {
    %c0_i32 = arith.constant 0 : i32
    %c0_i32_0 = arith.constant 0 : i32
    return %arg0, %c0_i32 : i32, i32
  }
  func.func @transform_1(%arg0: i32) -> (i32, i32) {
    %c0_i32 = arith.constant 0 : i32
    %c0_i32_0 = arith.constant 0 : i32
    %c0_i32_1 = arith.constant 0 : i32
    return %c0_i32, %c0_i32_0 : i32, i32
  }
  func.func @transform_2(%arg0: i32) -> (i32, i32) {
    %c0_i32 = arith.constant 0 : i32
    %c0_i32_0 = arith.constant 0 : i32
    %c0_i32_1 = arith.constant 0 : i32
    return %c0_i32, %c0_i32_0 : i32, i32
  }
  func.func @transform_3(%arg0: i32) -> (i32, i32) {
    %c0_i32 = arith.constant 0 : i32
    %c0_i32_0 = arith.constant 0 : i32
    %c0_i32_1 = arith.constant 0 : i32
    return %c0_i32, %c0_i32_0 : i32, i32
  }
  func.func @transform_4(%arg0: i32) -> (i32, i32) {
    %c0_i32 = arith.constant 0 : i32
    %c0_i32_0 = arith.constant 0 : i32
    %c0_i32_1 = arith.constant 0 : i32
    return %c0_i32, %c0_i32_0 : i32, i32
  }
  func.func @transform_5(%arg0: i32) -> (i32, i32) {
    %c0_i32 = arith.constant 0 : i32
    %c0_i32_0 = arith.constant 0 : i32
    %c0_i32_1 = arith.constant 0 : i32
    return %c0_i32, %c0_i32_0 : i32, i32
  }
  func.func @transform_6(%arg0: i32) -> (i32, i32) {
    %c0_i32 = arith.constant 0 : i32
    %c0_i32_0 = arith.constant 0 : i32
    %c0_i32_1 = arith.constant 0 : i32
    return %c0_i32, %c0_i32_0 : i32, i32
  }
  func.func @transform_7(%arg0: i32) -> (i32, i32) {
    %c0_i32 = arith.constant 0 : i32
    %c0_i32_0 = arith.constant 0 : i32
    %c0_i32_1 = arith.constant 0 : i32
    return %c0_i32, %c0_i32_0 : i32, i32
  }
  func.func @transform_8(%arg0: i32) -> (i32, i32) {
    %c0_i32 = arith.constant 0 : i32
    %c0_i32_0 = arith.constant 0 : i32
    %c0_i32_1 = arith.constant 0 : i32
    return %c0_i32, %c0_i32_0 : i32, i32
  }
  func.func @transform_9(%arg0: i32) -> (i32, i32) {
    %c0_i32 = arith.constant 0 : i32
    %c0_i32_0 = arith.constant 0 : i32
    %c0_i32_1 = arith.constant 0 : i32
    return %c0_i32, %c0_i32_0 : i32, i32
  }
  func.func @transform_10(%arg0: i32) -> (i32, i32) {
    %c0_i32 = arith.constant 0 : i32
    %c0_i32_0 = arith.constant 0 : i32
    %c0_i32_1 = arith.constant 0 : i32
    return %c0_i32, %c0_i32_0 : i32, i32
  }
  func.func @transform_11(%arg0: i32) -> (i32, i32) {
    %c0_i32 = arith.constant 0 : i32
    %c0_i32_0 = arith.constant 0 : i32
    return %arg0, %c0_i32 : i32, i32
  }
}

</mosaic_0001>

<bundles_post_ra>
// kernel: autoencoder_forward.1
= control target key start
LH: loop header
LB: loop body
LE: loop exit
PB: predicated region body
PF: predicated region fallthrough
CT: control target
= control target key end

     0   :  { %s1319_s17 = smov 0   ;;  %s1442_s0 = inlined_call_operand.vmem [shape: f32[64,64], index: 0, kind: input, shape index: {}]   ;;  %s1443_s1 = inlined_call_operand.vmem [shape: f32[64,32], index: 1, kind: input, shape index: {}]   ;;  %s1444_s2 = inlined_call_operand.vmem [shape: f32[1,32], index: 2, kind: input, shape index: {}]   ;;  %s1445_s3 = inlined_call_operand.vmem [shape: f32[32,16], index: 3, kind: input, shape index: {}]   ;;  %s1446_s4 = inlined_call_operand.vmem [shape: f32[1,16], index: 4, kind: input, shape index: {}]   ;;  %s1447_s5 = inlined_call_operand.vmem [shape: f32[16,16], index: 5, kind: input, shape index: {}]   ;;  %s1448_s6 = inlined_call_operand.vmem [shape: f32[1,16], index: 6, kind: input, shape index: {}]   ;;  %s1449_s7 = inlined_call_operand.vmem [shape: f32[16,32], index: 7, kind: input, shape index: {}]   ;;  %s1450_s8 = inlined_call_operand.vmem [shape: f32[1,32], index: 8, kind: input, shape index: {}]   ;;  %s1451_s9 = inlined_call_operand.vmem [shape: f32[32,64], index: 9, kind: input, shape index: {}]   ;;  %s1452_s10 = inlined_call_operand.vmem [shape: f32[1,64], index: 10, kind: input, shape index: {}]   ;;  %s1453_s11 = inlined_call_operand.vmem [shape: f32[64,64], index: 11, kind: output, shape index: {}]  }
   0x1 LB: > { %s1037_s18 = sadd.s32 4294967295, %s1257_s17   ;;  %p1041_p0 = scmp.ge.s32.totalorder %s1257_s17, 1  ;;  %s1257_s17 = sphi %s1319_s17, %s21_s17  }
   0x2   : > { %p338_p1 = scmp.lt.s32.totalorder %s1257_s17, 3 }
   0x4   : > { %p339_p2 = pnand %p1041_p0, %p338_p1 }
   0x5   : > { %v394_v0 = vld [vmem:[%s1443_s1] sm:$0xff] (!%p339_p2)  ;;  %v395_v1 = vld [vmem:[%s1443_s1 + $0x8] sm:$0xff] (!%p339_p2)  ;;  %v396_v2 = vld [vmem:[%s1443_s1 + $0x10] sm:$0xff] (!%p339_p2)  ;;  %s1042_s25 = sshll.u32 (!%p339_p2), %s1037_s18, 2  ;;  %vm409_vm0 = vcmask (!%p339_p2), 523264   ;;  %vm522_vm1 = vcmask (!%p339_p2), 261120  }
   0x6   : > { %342 = sbr.rel (%p339_p2) target bundleno = 1143 (0x477), region = 64  ;;  %v1187_v3 = vpack.c.bf16 (!%p339_p2), %v395_v1, %v394_v0  ;;  %v397_v4 = vld [vmem:[%s1443_s1 + $0x18] sm:$0xff] (!%p339_p2)  ;;  %p379_p3 = scmp.lt.s32.totalorder (!%p339_p2), %s1042_s25, 7  ;;  %v398_v6 = vld [vmem:[%s1443_s1 + $0x20] sm:$0xff] (!%p339_p2)  ;;  %v399_v7 = vld [vmem:[%s1443_s1 + $0x28] sm:$0xff] (!%p339_p2)  ;;  %vm633_vm2 = vcmask (!%p339_p2), 130048  }
   0x7   : > { %v1191_v5 = vpack.c.bf16 (!%p339_p2), %v397_v4, %v396_v2  ;;  %v511_v8 = vld [vmem:[%s1445_s3] sm:$0xff] (!%p339_p2)  ;;  %v512_v9 = vld [vmem:[%s1445_s3 + $0x8] sm:$0xff] (!%p339_p2)  ;;  %v1195_v11 = vpack.c.bf16 (!%p339_p2), %v399_v7, %v398_v6  ;;  %v400_v12 = vld [vmem:[%s1443_s1 + $0x30] sm:$0xff] (!%p339_p2) }
   0x8   : > { %1188 = vmatprep.subr.bf16.mxu0 (!%p339_p2), %v1187_v3  ;;  %v1203_v10 = vpack.c.bf16 (!%p339_p2), %v512_v9, %v511_v8  ;;  %v401_v13 = vld [vmem:[%s1443_s1 + $0x38] sm:$0xff] (!%p339_p2)  ;;  %v513_v19 = vld [vmem:[%s1445_s3 + $0x10] sm:$0xff] (!%p339_p2)  ;;  %v624_v22 = vld [vmem:[%s1447_s5] sm:$0xff] (!%p339_p2) }
   0x9   : > { %1190 = vmatpush3.bf16.msra.mxu0 (!%p339_p2), %v1187_v3  ;;  %v1199_v15 = vpack.c.bf16 (!%p339_p2), %v401_v13, %v400_v12  ;;  %v514_v20 = vld [vmem:[%s1445_s3 + $0x18] sm:$0xff] (!%p339_p2)  ;;  %v625_v23 = vld [vmem:[%s1447_s5 + $0x8] sm:$0xff] (!%p339_p2)  ;;  %v1046_v25 = vld [vmem:[%s1444_s2] ss:$0 sm:$0xff] (!%p339_p2) }
   0xa   : > { %1192 = vmatprep.subr.bf16.mxu0 (!%p339_p2), %v1191_v5  ;;  %1204 = vmatprep.subr.bf16.mxu1 (!%p339_p2), %v1203_v10  ;;  %v1207_v21 = vpack.c.bf16 (!%p339_p2), %v514_v20, %v513_v19  ;;  %v1211_v24 = vpack.c.bf16 (!%p339_p2), %v625_v23, %v624_v22  ;;  %v735_v38 = vld [vmem:[%s1449_s7] sm:$0xff] (!%p339_p2)  ;;  %v736_v39 = vld [vmem:[%s1449_s7 + $0x8] sm:$0xff] (!%p339_p2)  ;;  %v847_v6 = vld [vmem:[%s1451_s9 + $0x10] sm:$0xff] (!%p339_p2) }
   0xb   : > { %1206 = vmatpush3.bf16.msra.mxu1 (!%p339_p2), %v1203_v10  ;;  %v1215_v40 = vpack.c.bf16 (!%p339_p2), %v736_v39, %v735_v38  ;;  %v1051_v41 = vld [vmem:[%s1446_s4] ss:$0 sm:$0xff] (!%p339_p2)  ;;  %v846_v55 = vld [vmem:[%s1451_s9 + $0x8] sm:$0xff] (!%p339_p2)  ;;  %v848_v7 = vld [vmem:[%s1451_s9 + $0x18] sm:$0xff] (!%p339_p2) }
   0xc   : > { %1208 = vmatprep.subr.bf16.mxu1 (!%p339_p2), %v1207_v21  ;;  %v845_v54 = vld [vmem:[%s1451_s9] sm:$0xff] (!%p339_p2)  ;;  %v1223_v8 = vpack.c.bf16 (!%p339_p2), %v848_v7, %v847_v6 }
   0xd   : > { %s1455_s25 = smov (!%p379_p3, %s1042_s25), 7  ;;  %1194 = vmatpush3.bf16.msra.mxu0 %v1191_v5  ;;  %v1219_v56 = vpack.c.bf16 %v846_v55, %v845_v54  ;;  %v1056_v57 = vld [vmem:[%s1448_s6] ss:$0 sm:$0xff] }
   0xe   : > { %s1043_s18 = sshll.u32 %s1455_s25, 3  ;;  %1196 = vmatprep.subr.bf16.mxu0 %v1195_v11  ;;  %v1061_v9 = vld [vmem:[%s1450_s8] ss:$0 sm:$0xff] }
   0xf   : > { %s382_s26 = scalar_lea.vmem %s1442_s0, %s1043_s18  ;;  %1210 = vmatpush3.bf16.msra.mxu1 %v1207_v21  ;;  %v1066_v22 = vld [vmem:[%s1452_s10] ss:$0 sm:$0xff]  ;;  %s388_s27 = scalar_lea.vmem %s1453_s11, %s1043_s18 }
  0x10   : > { %v390_v14 = vld [vmem:[%s382_s26] sm:$0xff]  ;;  %v391_v16 = vld [vmem:[%s382_s26 + $0x8] sm:$0xff]  ;;  %v392_v17 = vld [vmem:[%s382_s26 + $0x10] sm:$0xff]  ;;  %1212 = vmatprep.subr.bf16.mxu1 %v1211_v24 }
  0x11   : > { %1133 = vmatprep.mubr.msk.f32.mxu0 %vm409_vm0, %v390_v14  ;;  %1198 = vmatpush3.bf16.msra.mxu0 %v1195_v11  ;;  %v393_v18 = vld [vmem:[%s382_s26 + $0x18] sm:$0xff] }
  0x12   : > { %1200 = vmatprep.subr.bf16.mxu0 %v1199_v15 }
  0x15   : > { %1202 = vmatpush3.bf16.msra.mxu0 %v1199_v15 }
  0x16   : > { %1216 = vmatprep.subr.bf16.mxu0 %v1215_v40 }
  0x18   : > { %1134 = vmatmul.mubr.msk.f32.vlgmr.msra.gmra.mrb[0].mxu0 %vm409_vm0, %v391_v16 }
  0x19   : > { %1136 = vmatprep.mubr.msk.f32.mxu0 %vm409_vm0, %v392_v17  ;;  %1218 = vmatpush3.bf16.msra.mxu0 %v1215_v40 }
  0x1c   : > { %1137 = vmatmul.mubr.msk.f32.gmra.mrb[2].mxu0 %vm409_vm0, %v393_v18 }
  0xeb   : > { %v1135_v26 = vpop.f32.mrb[0].mxu0 }
  0xec   : > { %v494_v27 = vadd.f32 %v1135_v26, %v1046_v25  ;;  %v488_v28 = vpop.f32.mrb[1].mxu0 }
  0xed   : > { %v489_v29 = vadd.f32 %v1046_v25, %v488_v28 }
  0xee   : > { %v508_v32 = vmax.f32 %v494_v27, 0.0 }
  0xef   : > { %v507_v30 = vmax.f32 %v489_v29, 0.0  ;;  %v1138_v31 = vpop.f32.mrb[2].mxu0 }
  0xf0   : > { %v504_v33 = vadd.f32 %v1138_v31, %v1046_v25  ;;  %v498_v34 = vpop.f32.mrb[3].mxu0 }
  0xf1   : > { %v499_v35 = vadd.f32 %v1046_v25, %v498_v34  ;;  %1147 = vmatprep.mubr.msk.f32.mxu1 %vm522_vm1, %v507_v30 }
  0xf2   : > { %1148 = vmatmul.mubr.msk.f32.vlgmr.msra.gmra.mrb[0].mxu1 %vm522_vm1, %v508_v32  ;;  %v510_v37 = vmax.f32 %v504_v33, 0.0 }
  0xf3   : > { %v509_v36 = vmax.f32 %v499_v35, 0.0  ;;  %1214 = vmatpush3.bf16.msra.mxu1 %v1211_v24 }
  0xf4   : > { %1220 = vmatprep.subr.bf16.mxu1 %v1219_v56 }
  0xf5   : > { %1150 = vmatprep.mubr.msk.f32.mxu1 %vm522_vm1, %v509_v36 }
  0xf6   : > { %1151 = vmatmul.mubr.msk.f32.gmra.mrb[2].mxu1 %vm522_vm1, %v510_v37 }
 0x1c5   : > { %v1149_v42 = vpop.f32.mrb[0].mxu1 }
 0x1c6   : > { %v607_v43 = vadd.f32 %v1149_v42, %v1051_v41  ;;  %v601_v44 = vpop.f32.mrb[1].mxu1 }
 0x1c7   : > { %v602_v45 = vadd.f32 %v1051_v41, %v601_v44 }
 0x1c8   : > { %v621_v48 = vmax.f32 %v607_v43, 0.0 }
 0x1c9   : > { %v620_v46 = vmax.f32 %v602_v45, 0.0  ;;  %v1152_v47 = vpop.f32.mrb[2].mxu1 }
 0x1ca   : > { %v617_v49 = vadd.f32 %v1152_v47, %v1051_v41  ;;  %v611_v50 = vpop.f32.mrb[3].mxu1 }
 0x1cb   : > { %v612_v51 = vadd.f32 %v1051_v41, %v611_v50  ;;  %1157 = vmatprep.mubr.msk.f32.mxu1 %vm633_vm2, %v620_v46 }
 0x1cc   : > { %1158 = vmatmul.mubr.msk.f32.vlgmr.msra.gmra.mrb[4].mxu1 %vm633_vm2, %v621_v48  ;;  %v623_v53 = vmax.f32 %v617_v49, 0.0 }
 0x1cd   : > { %v622_v52 = vmax.f32 %v612_v51, 0.0  ;;  %1222 = vmatpush3.bf16.msra.mxu1 %v1219_v56 }
 0x1ce   : > { %1224 = vmatprep.subr.bf16.mxu1 %v1223_v8 }
 0x1cf   : > { %1160 = vmatprep.mubr.msk.f32.mxu1 %vm633_vm2, %v622_v52 }
 0x1d0   : > { %1161 = vmatmul.mubr.msk.f32.gmra.mrb[6].mxu1 %vm633_vm2, %v623_v53 }
 0x1d1   : > { %1226 = vmatpush3.bf16.msra.mxu1 %v1223_v8 }
 0x29f   : > { %v1159_v58 = vpop.f32.mrb[4].mxu1 }
 0x2a0   : > { %v718_v59 = vadd.f32 %v1159_v58, %v1056_v57  ;;  %v712_v60 = vpop.f32.mrb[5].mxu1 }
 0x2a1   : > { %v713_v61 = vadd.f32 %v1056_v57, %v712_v60 }
 0x2a2   : > { %v732_v0 = vmax.f32 %v718_v59, 0.0 }
 0x2a3   : > { %v731_v62 = vmax.f32 %v713_v61, 0.0  ;;  %v1162_v63 = vpop.f32.mrb[6].mxu1 }
 0x2a4   : > { %v728_v1 = vadd.f32 %v1162_v63, %v1056_v57  ;;  %v722_v2 = vpop.f32.mrb[7].mxu1 }
 0x2a5   : > { %v723_v3 = vadd.f32 %v1056_v57, %v722_v2  ;;  %1167 = vmatprep.mubr.msk.f32.mxu0 %vm633_vm2, %v731_v62 }
 0x2a6   : > { %1168 = vmatmul.mubr.msk.f32.vlgmr.msra.gmra.mrb[4].mxu0 %vm633_vm2, %v732_v0  ;;  %v734_v5 = vmax.f32 %v728_v1, 0.0 }
 0x2a7   : > { %v733_v4 = vmax.f32 %v723_v3, 0.0 }
 0x2a9   : > { %1170 = vmatprep.mubr.msk.f32.mxu0 %vm633_vm2, %v733_v4 }
 0x2aa   : > { %1171 = vmatmul.mubr.msk.f32.gmra.mrb[6].mxu0 %vm633_vm2, %v734_v5 }
 0x379   : > { %v1169_v10 = vpop.f32.mrb[4].mxu0 }
 0x37a   : > { %v828_v11 = vadd.f32 %v1169_v10, %v1061_v9  ;;  %v822_v12 = vpop.f32.mrb[5].mxu0 }
 0x37b   : > { %v823_v13 = vadd.f32 %v1061_v9, %v822_v12 }
 0x37c   : > { %v842_v16 = vmax.f32 %v828_v11, 0.0 }
 0x37d   : > { %v841_v14 = vmax.f32 %v823_v13, 0.0  ;;  %v1172_v15 = vpop.f32.mrb[6].mxu0 }
 0x37e   : > { %v838_v17 = vadd.f32 %v1172_v15, %v1061_v9  ;;  %v832_v18 = vpop.f32.mrb[7].mxu0 }
 0x37f   : > { %v833_v19 = vadd.f32 %v1061_v9, %v832_v18  ;;  %1181 = vmatprep.mubr.msk.f32.mxu1 %vm522_vm1, %v841_v14 }
 0x380   : > { %1182 = vmatmul.mubr.msk.f32.vlgmr.msra.gmra.mrb[8].mxu1 %vm522_vm1, %v842_v16  ;;  %v844_v21 = vmax.f32 %v838_v17, 0.0 }
 0x381   : > { %v843_v20 = vmax.f32 %v833_v19, 0.0 }
 0x383   : > { %1184 = vmatprep.mubr.msk.f32.mxu1 %vm522_vm1, %v843_v20 }
 0x384   : > { %1185 = vmatmul.mubr.msk.f32.gmra.mrb[10].mxu1 %vm522_vm1, %v844_v21 }
 0x453   : > { %v1183_v23 = vpop.f32.mrb[8].mxu1 }
 0x454   : > { %v940_v24 = vadd.f32 %v1183_v23, %v1066_v22  ;;  %v934_v25 = vpop.f32.mrb[9].mxu1 }
 0x455   : > { %v935_v26 = vadd.f32 %v1066_v22, %v934_v25 }
 0x456   : > { %v1072_v27 = vmul.f32 -1.442695, %v940_v24 }
 0x457   : > { %v1071_v28 = vmul.f32 -1.442695, %v935_v26  ;;  %v1186_v29 = vpop.f32.mrb[10].mxu1 }
 0x458   : > { %1235 = vpow2.f32 %v1072_v27  ;;  %v950_v30 = vadd.f32 %v1186_v29, %v1066_v22  ;;  %v944_v31 = vpop.f32.mrb[11].mxu1 }
 0x459   : > { %1237 = vpow2.f32 %v1071_v28  ;;  %v945_v32 = vadd.f32 %v1066_v22, %v944_v31 }
 0x45a   : > { %v1074_v33 = vmul.f32 -1.442695, %v950_v30 }
 0x45b   : > { %v1073_v34 = vmul.f32 -1.442695, %v945_v32 }
 0x45c   : > { %1239 = vpow2.f32 %v1074_v33 }
 0x45d   : > { %1241 = vpow2.f32 %v1073_v34 }
 0x462   : > { %v1236_v35 = vpop.eup %1235 }
 0x463   : > { %v1238_v36 = vpop.eup %1237  ;;  %v966_v37 = vadd.f32 1.0, %v1236_v35 }
 0x464   : > { %v965_v38 = vadd.f32 1.0, %v1238_v36 }
 0x466   : > { %v1240_v39 = vpop.eup %1239  ;;  %1243 = vrcp.f32 %v965_v38 }
 0x467   : > { %v1242_v40 = vpop.eup %1241  ;;  %1245 = vrcp.f32 %v966_v37  ;;  %v968_v41 = vadd.f32 1.0, %v1240_v39 }
 0x468   : > { %v967_v42 = vadd.f32 1.0, %v1242_v40 }
 0x46a   : > { %1247 = vrcp.f32 %v967_v42 }
 0x46b   : > { %1249 = vrcp.f32 %v968_v41 }
 0x470   : > { %v1244_v43 = vpop.eup %1243 }
 0x471   : > { %v1246_v44 = vpop.eup %1245  ;;  %977 = vst.msk [vmem:[%s388_s27] sm:$0xff] %vm409_vm0, %v1244_v43 }
 0x472   : > { %978 = vst.msk [vmem:[%s388_s27 + $0x8] sm:$0xff] %vm409_vm0, %v1246_v44 }
 0x474   : > { %v1248_v45 = vpop.eup %1247 }
 0x475   : > { %v1250_v46 = vpop.eup %1249  ;;  %979 = vst.msk [vmem:[%s388_s27 + $0x10] sm:$0xff] %vm409_vm0, %v1248_v45 }
 0x476   : > { %980 = vst.msk [vmem:[%s388_s27 + $0x18] sm:$0xff] %vm409_vm0, %v1250_v46 }
 0x477 PF: > { %s21_s17 = sadd.s32 1, %s1257_s17  }
 0x478   : > { %p18_p4 = scmp.ge.s32.totalorder %s21_s17, 4  }
 0x47a   :  { %20 = sbr.rel (!%p18_p4) target bundleno = 1 (0x1), region = 94 }

</bundles_post_ra>
